<compile_context>
chip_gen: v7x
topology: tpu7x:2x2x1
jax: 0.10.0
libtpu: 0.0.40
codegen_flags: <defaults>
</compile_context>

<pallas_src>
import math
from functools import partial

import jax
import jax.numpy as jnp
from jax.experimental import pallas as pl
from jax.experimental.pallas import tpu as pltpu

_LANE = 128
_SUB = 8
_ROW_GRAN = 32        # row granularity for tiled blocks: covers f32 (8,128),
                      # bf16 (16,128) and int8 (32,128) VMEM tiling
_ROW_TILE = 8192      # rows per grid step -> 8192*128*4B = 4 MiB per f32 block
_VMEM_LIMIT = 32 * 1024 * 1024   # safe on v5e/v6e (128 MiB phys) and v7x (64 MiB)

_CPARAMS = pltpu.CompilerParams(
    dimension_semantics=("parallel", "parallel", "arbitrary"),
    vmem_limit_bytes=_VMEM_LIMIT,
)


def _cdiv(a, b):
    return -(-a // b)


def _round_up(x, m):
    return _cdiv(x, m) * m


def _tensorcores_per_device():
    """2 only where one device really has 2 TensorCores (v7x, v4/v5p megacore)."""
    try:
        kind = jax.devices()[0].device_kind.lower()
    except Exception:
        return 1
    if "lite" in kind or "v5e" in kind or "v6" in kind:
        return 1            # v5e / v6e: single TensorCore per device
    if "v4" in kind or "v5" in kind or "7" in kind:
        return 2            # v4 / v5p megacore, v7x: 2 TensorCores
    return 1


def _plan(rows_min, lane_aligned, num_tc):
    """Tiling plan for a stream of `rows_min` 128-lane rows.

    Returns (rows, tile_rows, num_chunks, steps, total_tiles, needs_tail).
    `rows` is the row count the wrapper must materialize (== rows_min whenever
    no padding is required).
    """
    if rows_min <= _ROW_TILE:
        # Single block covering the whole extent: block dims == array dims, so
        # no (8/16/32, 128) divisibility requirement and no tail handling.
        return rows_min, rows_min, 1, 1, 1, False
    if lane_aligned and rows_min % _ROW_GRAN == 0:
        rows = rows_min                          # zero-copy
    else:
        rows = _round_up(rows_min, _ROW_GRAN)    # minimal pad (copy unavoidable)
    tile_rows = _ROW_TILE
    total_tiles = _cdiv(rows, tile_rows)
    num_chunks = min(num_tc, total_tiles)
    steps = _cdiv(total_tiles, num_chunks)
    needs_tail = (num_chunks * steps * tile_rows) != rows
    return rows, tile_rows, num_chunks, steps, total_tiles, needs_tail


def _specs(tile_rows, steps, total_tiles, needs_tail):
    if needs_tail:
        def in_map(g, c, j):
            # Clamp so duplicate trailing grid points stay in bounds; their
            # contribution is skipped in-kernel.
            return (g, jnp.minimum(c * steps + j, total_tiles - 1), 0)
    else:
        def in_map(g, c, j):
            return (g, c * steps + j, 0)
    in_spec = pl.BlockSpec((None, tile_rows, _LANE), in_map)
    slab_spec = pl.BlockSpec((None, None, _SUB, _LANE), lambda g, c, j: (g, c, 0, 0))
    return in_spec, slab_spec


def _fold_rows(v):
    """(R, 128) f32 -> (8, 128) per-(sublane, lane) partial sums (R is static)."""
    r = v.shape[0]
    full = (r // _SUB) * _SUB
    if full == r:
        return v.reshape(-1, _SUB, _LANE).sum(axis=0)
    # Odd small single-block shapes only.
    acc = (v[:full].reshape(-1, _SUB, _LANE).sum(axis=0)
           if full else jnp.zeros((_SUB, _LANE), jnp.float32))
    tail = jnp.concatenate(
        [v[full:], jnp.zeros((_SUB - (r - full), _LANE), jnp.float32)], axis=0)
    return acc + tail


# -------------------- unmasked sum of squared diffs (mean & none) --------------------
def _sq_sum_kernel(x_ref, y_ref, sum_ref, *, tile_rows, steps, rows,
                   total_tiles, needs_tail):
    c = pl.program_id(1)
    j = pl.program_id(2)

    @pl.when(j == 0)
    def _():
        sum_ref[...] = jnp.zeros_like(sum_ref)

    d = x_ref[...].astype(jnp.float32) - y_ref[...].astype(jnp.float32)
    sq = d * d

    if not needs_tail:
        sum_ref[...] += _fold_rows(sq)
    else:
        t = c * steps + j

        @pl.when(t < total_tiles - 1)            # full interior tile: no masking
        def _():
            sum_ref[...] += _fold_rows(sq)

        @pl.when(t == total_tiles - 1)           # ragged last tile only
        def _():
            ridx = t * tile_rows + jax.lax.broadcasted_iota(jnp.int32, sq.shape, 0)
            # True select: ragged edge-block VMEM past the array end is
            # undefined (possibly Inf/NaN); never rewrite as multiply-by-mask.
            sum_ref[...] += _fold_rows(jnp.where(ridx < rows, sq, 0.0))
        # t > total_tiles - 1 (clamped duplicate tile): accumulate nothing.


# -------------------- masked sum of squared diffs (reduction='mean') --------------------
def _masked_sq_sum_kernel(x_ref, y_ref, m_ref, sum_ref, cnt_ref, *, tile_rows,
                          steps, rows, total_tiles, needs_tail):
    c = pl.program_id(1)
    j = pl.program_id(2)

    @pl.when(j == 0)
    def _():
        sum_ref[...] = jnp.zeros_like(sum_ref)
        cnt_ref[...] = jnp.zeros_like(cnt_ref)

    d = x_ref[...].astype(jnp.float32) - y_ref[...].astype(jnp.float32)
    sq = d * d
    m = m_ref[...].astype(jnp.float32)           # int8 0/1 -> f32 (free VPU work)

    def _acc(sq_t, m_t):
        sum_ref[...] += _fold_rows(sq_t * m_t)
        cnt_ref[...] += _fold_rows(m_t)

    if not needs_tail:
        _acc(sq, m)
    else:
        t = c * steps + j

        @pl.when(t < total_tiles - 1)
        def _():
            _acc(sq, m)

        @pl.when(t == total_tiles - 1)
        def _():
            ridx = t * tile_rows + jax.lax.broadcasted_iota(jnp.int32, sq.shape, 0)
            valid = ridx < rows
            # Keep both selects before the multiply: garbage Inf * 0 would be NaN.
            _acc(jnp.where(valid, sq, 0.0), jnp.where(valid, m, 0.0))


def psnr(inputs, targets, valid_mask=None, reduction="mean"):
    assert reduction in ("mean", "none")
    x = jnp.asarray(inputs)
    y = jnp.asarray(targets)
    num_tc = _tensorcores_per_device()

    if reduction == "mean":
        n = math.prod(x.shape)
        lane_aligned = (n % _LANE == 0)
        rows_min = _cdiv(n, _LANE)
        rows, tile_rows, num_chunks, steps, total_tiles, needs_tail = _plan(
            rows_min, lane_aligned, num_tc)

        def to3d(a):
            flat = a.reshape(-1)
            target = rows * _LANE
            if target != n:                       # single minimal tail pad
                flat = jnp.pad(flat, (0, target - n))
            return flat.reshape(1, rows, _LANE)

        x3, y3 = to3d(x), to3d(y)
        in_spec, slab_spec = _specs(tile_rows, steps, total_tiles, needs_tail)
        slab_shape = jax.ShapeDtypeStruct((1, num_chunks, _SUB, _LANE), jnp.float32)

        if valid_mask is None:
            kernel = partial(_sq_sum_kernel, tile_rows=tile_rows, steps=steps,
                             rows=rows, total_tiles=total_tiles,
                             needs_tail=needs_tail)
            sums = pl.pallas_call(
                kernel,
                out_shape=slab_shape,
                grid_spec=pltpu.PrefetchScalarGridSpec(
                    num_scalar_prefetch=0,
                    grid=(1, num_chunks, steps),
                    in_specs=[in_spec, in_spec],
                    out_specs=slab_spec,
                ),
                compiler_params=_CPARAMS,
            )(x3, y3)
            return -10.0 * jnp.log10(jnp.sum(sums) / n)   # count is statically n

        # NOTE(perf): the astype(int8) below (plus any padding) is a separate
        # XLA pass over the mask that cannot fuse into the pallas_call (~2n
        # extra HBM bytes).  TODO(synk): stream the bool mask ref directly once
        # bool memrefs are verified to lower on all target chip generations.
        m = jnp.asarray(valid_mask).reshape(-1)
        if m.dtype not in (jnp.int8, jnp.uint8):
            m = m.astype(jnp.int8)
        m3 = to3d(m)
        kernel = partial(_masked_sq_sum_kernel, tile_rows=tile_rows, steps=steps,
                         rows=rows, total_tiles=total_tiles, needs_tail=needs_tail)
        sums, cnts = pl.pallas_call(
            kernel,
            out_shape=(slab_shape, slab_shape),
            grid_spec=pltpu.PrefetchScalarGridSpec(
                num_scalar_prefetch=0,
                grid=(1, num_chunks, steps),
                in_specs=[in_spec, in_spec, in_spec],
                out_specs=(slab_spec, slab_spec),
            ),
            compiler_params=_CPARAMS,
        )(x3, y3, m3)
        # All-False mask -> 0/0 -> NaN, matching torch.mean of an empty selection.
        return -10.0 * jnp.log10(jnp.sum(sums) / jnp.sum(cnts))

    # -------------------- reduction == 'none' --------------------
    if valid_mask is not None:
        # TODO(synk): torch's value[valid_mask] with reduction='none' yields a
        # ragged 1-D tensor; no dense-kernel equivalent -- not implemented.
        raise NotImplementedError("valid_mask with reduction='none'")

    B = x.shape[0]
    per = math.prod(x.shape[1:])
    lane_aligned = (per % _LANE == 0)
    rows_min = _cdiv(per, _LANE)
    rows, tile_rows, num_chunks, steps, total_tiles, needs_tail = _plan(
        rows_min, lane_aligned, num_tc)

    def to3d(a):
        a2 = a.reshape(B, per)
        target = rows * _LANE
        if target != per:                          # single minimal tail pad
            a2 = jnp.pad(a2, ((0, 0), (0, target - per)))
        return a2.reshape(B, rows, _LANE)

    x3, y3 = to3d(x), to3d(y)
    in_spec, slab_spec = _specs(tile_rows, steps, total_tiles, needs_tail)
    kernel = partial(_sq_sum_kernel, tile_rows=tile_rows, steps=steps,
                     rows=rows, total_tiles=total_tiles, needs_tail=needs_tail)
    sums = pl.pallas_call(
        kernel,
        out_shape=jax.ShapeDtypeStruct((B, num_chunks, _SUB, _LANE), jnp.float32),
        grid_spec=pltpu.PrefetchScalarGridSpec(
            num_scalar_prefetch=0,
            grid=(B, num_chunks, steps),
            in_specs=[in_spec, in_spec],
            out_specs=slab_spec,
        ),
        compiler_params=_CPARAMS,
    )(x3, y3)
    return -10.0 * jnp.log10(jnp.sum(sums, axis=(1, 2, 3)) / per)


def _psnr_ref(x, y, valid_mask=None, reduction="mean"):
    x = jnp.asarray(x, jnp.float32)
    y = jnp.asarray(y, jnp.float32)
    v = (x - y) ** 2
    if valid_mask is not None:
        v = v[valid_mask]
    if reduction == "mean":
        return -10.0 * jnp.log10(jnp.mean(v))
    return -10.0 * jnp.log10(jnp.mean(v.reshape(v.shape[0], -1), axis=1))


if __name__ == "__main__":
    key = jax.random.PRNGKey(0)
    k1, k2, k3 = jax.random.split(key, 3)
    shape = (2, 4, 16, 16)  # NCHW
    x = jax.random.uniform(k1, shape, jnp.float32)
    y = jax.random.uniform(k2, shape, jnp.float32)
    mask = jax.random.bernoulli(k3, 0.7, shape)

    # reduction='mean'
    out_mean = jax.block_until_ready(psnr(x, y, reduction="mean"))
    ref_mean = _psnr_ref(x, y, reduction="mean")
    assert jnp.allclose(out_mean, ref_mean, rtol=1e-5, atol=1e-5), (out_mean, ref_mean)

    # reduction='mean' with valid_mask
    out_masked = jax.block_until_ready(psnr(x, y, valid_mask=mask, reduction="mean"))
    ref_masked = _psnr_ref(x, y, valid_mask=mask, reduction="mean")
    assert jnp.allclose(out_masked, ref_masked, rtol=1e-5, atol=1e-5), (
        out_masked,
        ref_masked,
    )

    # reduction='none'
    out_none = jax.block_until_ready(psnr(x, y, reduction="none"))
    ref_none = _psnr_ref(x, y, reduction="none")
    assert out_none.shape == (shape[0],)
    assert jnp.allclose(out_none, ref_none, rtol=1e-5, atol=1e-5), (out_none, ref_none)

    # non-f32 inputs are streamed natively and upcast in-kernel
    xb = x.astype(jnp.bfloat16)
    yb = y.astype(jnp.bfloat16)
    out_bf16 = jax.block_until_ready(psnr(xb, yb, reduction="mean"))
    ref_bf16 = _psnr_ref(xb.astype(jnp.float32), yb.astype(jnp.float32), reduction="mean")
    assert jnp.allclose(out_bf16, ref_bf16, rtol=1e-2, atol=1e-2), (out_bf16, ref_bf16)

    print("KERNEL_OK")
</pallas_src>

<mosaic_0001>
module attributes {stable_mosaic.version = 11 : i64} {
  func.func @_sq_sum_kernel(%arg0: i32, %arg1: i32, %arg2: i32, %arg3: memref<1x16x128xf32, #tpu.memory_space<vmem>>, %arg4: memref<1x16x128xf32, #tpu.memory_space<vmem>>, %arg5: memref<1x1x8x128xf32, #tpu.memory_space<vmem>>) attributes {dimension_semantics = [#tpu.dimension_semantics<parallel>, #tpu.dimension_semantics<parallel>, #tpu.dimension_semantics<arbitrary>], iteration_bounds = array<i64: 1, 1, 1>, scalar_prefetch = 0 : i64, scratch_operands = 0 : i64, tpu.core_type = #tpu.core_type<tc>, window_params = [{transform_indices = @transform_0, window_bounds = array<i64: 1, 16, 128>}, {transform_indices = @transform_1, window_bounds = array<i64: 1, 16, 128>}, {transform_indices = @transform_2, window_bounds = array<i64: 1, 1, 8, 128>}]} {
    %c0_i32 = arith.constant 0 : i32
    %0 = arith.cmpi eq, %arg2, %c0_i32 : i32
    %1 = arith.extui %0 : i1 to i32
    %c0_i32_0 = arith.constant 0 : i32
    %2 = arith.cmpi ne, %1, %c0_i32_0 : i32
    scf.if %2 {
      %cst_14 = arith.constant 0.000000e+00 : f32
      %17 = vector.broadcast %cst_14 : f32 to vector<8x128xf32>
      %c0_15 = arith.constant 0 : index
      %c0_16 = arith.constant 0 : index
      %c0_17 = arith.constant 0 : index
      %c0_18 = arith.constant 0 : index
      %18 = vector.load %arg5[%c0_15, %c0_16, %c0_17, %c0_18] : memref<1x1x8x128xf32, #tpu.memory_space<vmem>>, vector<1x1x8x128xf32>
      %19 = vector.shape_cast %18 : vector<1x1x8x128xf32> to vector<8x128xf32>
      %20 = vector.shape_cast %17 : vector<8x128xf32> to vector<1x1x8x128xf32>
      tpu.vector_store %arg5[%c0_15, %c0_16, %c0_17, %c0_18], %20 {strides = array<i32>} : memref<1x1x8x128xf32, #tpu.memory_space<vmem>>, vector<1x1x8x128xf32>,
    } else {
    }
    %c0 = arith.constant 0 : index
    %c0_1 = arith.constant 0 : index
    %c0_2 = arith.constant 0 : index
    %3 = vector.load %arg3[%c0, %c0_1, %c0_2] : memref<1x16x128xf32, #tpu.memory_space<vmem>>, vector<1x16x128xf32>
    %4 = vector.shape_cast %3 : vector<1x16x128xf32> to vector<16x128xf32>
    %c0_3 = arith.constant 0 : index
    %c0_4 = arith.constant 0 : index
    %c0_5 = arith.constant 0 : index
    %5 = vector.load %arg4[%c0_3, %c0_4, %c0_5] : memref<1x16x128xf32, #tpu.memory_space<vmem>>, vector<1x16x128xf32>
    %6 = vector.shape_cast %5 : vector<1x16x128xf32> to vector<16x128xf32>
    %7 = arith.subf %4, %6 : vector<16x128xf32>
    %8 = arith.mulf %7, %7 : vector<16x128xf32>
    %c0_6 = arith.constant 0 : index
    %c0_7 = arith.constant 0 : index
    %c0_8 = arith.constant 0 : index
    %c0_9 = arith.constant 0 : index
    %9 = vector.load %arg5[%c0_6, %c0_7, %c0_8, %c0_9] : memref<1x1x8x128xf32, #tpu.memory_space<vmem>>, vector<1x1x8x128xf32>
    %10 = vector.shape_cast %9 : vector<1x1x8x128xf32> to vector<8x128xf32>
    %11 = vector.shape_cast %8 : vector<16x128xf32> to vector<2x8x128xf32>
    %cst = arith.constant dense<0.000000e+00> : vector<8x128xf32>
    %12 = vector.multi_reduction <add>, %11, %cst [0] : vector<2x8x128xf32> to vector<8x128xf32>
    %13 = arith.addf %10, %12 : vector<8x128xf32>
    %c0_10 = arith.constant 0 : index
    %c0_11 = arith.constant 0 : index
    %c0_12 = arith.constant 0 : index
    %c0_13 = arith.constant 0 : index
    %14 = vector.load %arg5[%c0_10, %c0_11, %c0_12, %c0_13] : memref<1x1x8x128xf32, #tpu.memory_space<vmem>>, vector<1x1x8x128xf32>
    %15 = vector.shape_cast %14 : vector<1x1x8x128xf32> to vector<8x128xf32>
    %16 = vector.shape_cast %13 : vector<8x128xf32> to vector<1x1x8x128xf32>
    tpu.vector_store %arg5[%c0_10, %c0_11, %c0_12, %c0_13], %16 {strides = array<i32>} : memref<1x1x8x128xf32, #tpu.memory_space<vmem>>, vector<1x1x8x128xf32>,
    return
  }
  func.func @transform_0(%arg0: i32, %arg1: i32, %arg2: i32) -> (i32, i32, i32) {
    %c1_i32 = arith.constant 1 : i32
    %0 = arith.muli %arg1, %c1_i32 : i32
    %1 = arith.addi %0, %arg2 : i32
    %c0_i32 = arith.constant 0 : i32
    %c0_i32_0 = arith.constant 0 : i32
    return %arg0, %1, %c0_i32 : i32, i32, i32
  }
  func.func @transform_1(%arg0: i32, %arg1: i32, %arg2: i32) -> (i32, i32, i32) {
    %c1_i32 = arith.constant 1 : i32
    %0 = arith.muli %arg1, %c1_i32 : i32
    %1 = arith.addi %0, %arg2 : i32
    %c0_i32 = arith.constant 0 : i32
    %c0_i32_0 = arith.constant 0 : i32
    return %arg0, %1, %c0_i32 : i32, i32, i32
  }
  func.func @transform_2(%arg0: i32, %arg1: i32, %arg2: i32) -> (i32, i32, i32, i32) {
    %c0_i32 = arith.constant 0 : i32
    %c0_i32_0 = arith.constant 0 : i32
    %c0_i32_1 = arith.constant 0 : i32
    return %arg0, %arg1, %c0_i32, %c0_i32_0 : i32, i32, i32, i32
  }
}

</mosaic_0001>

<bundles_post_ra>
// kernel: tpu_custom_call.1
= control target key start
LH: loop header
LB: loop body
LE: loop exit
PB: predicated region body
PF: predicated region fallthrough
CT: control target
= control target key end

     0   :  { %7 = vsyncpa [#allocation3], 0  ;;  %s219_s0 = inlined_call_operand.hbm [shape: f32[1,16,128], index: 0, kind: input, shape index: {}]   ;;  %s220_s1 = inlined_call_operand.hbm [shape: f32[1,16,128], index: 1, kind: input, shape index: {}]   ;;  %s221_s2 = inlined_call_operand.hbm [shape: f32[1,1,8,128], index: 2, kind: output, shape index: {}]  }
   0x1   :  { %8 = vsyncpa [#allocation6], 0 }
   0x2   :  { %9 = vsyncpa [#allocation4], 0  ;;  %s163_s9 = smov [#allocation2]   ;;  %s91_s13 = scalar_lea.hbm %s219_s0, 256 }
   0x3   :  { %s19_s10 = sshll.u32 %s163_s9, 4  ;;  %p92_p0 = scmp.ne.s32.totalorder %s219_s0, %s91_s13  ;;  %s20_s10 = int_to_ptr.vmem [resolvable:$true] %s19_s10 }
   0x4   :  { %p95_p1 = scmp.lt.u32.totalorder %s91_s13, %s219_s0 }
   0x6   :  { %p97_p2 = pnand %p95_p1, %p92_p0 }
   0x8   :  { %100 = shalt.err (!%p97_p2)
}
   0x9   :  { %s101_s18 = scalar_lea.vmem %s20_s10, 256  ;;  %p106_p4 = scmp.lt.s32.totalorder %s20_s10, %s20_s10 }
   0xa   :  { %p102_p3 = scmp.ne.s32.totalorder %s20_s10, %s101_s18  ;;  %p107_p5 = scmp.lt.s32.totalorder %s101_s18, %s101_s18 }
   0xc   :  { %p108_p6 = por %p107_p5, %p106_p4 }
   0xe   :  { %p109_p7 = pnand %p108_p6, %p102_p3 }
  0x10   :  { %112 = shalt.err (!%p109_p7)
}
  0x11   :  { %s164_s19 = smov 128   ;;  %s165_s20 = smov 8  }
  0x12   :  { %25 = dma.hbm_to_vmem [thread:$0]  %s219_s0, 256, %s20_s10, [#allocation3], %s164_s19, %s164_s19, %s165_s20  }
  0x13   :  { %s166_s23 = smov [#allocation5]   ;;  %s113_s27 = scalar_lea.hbm %s220_s1, 256 }
  0x14   :  { %s35_s24 = sshll.u32 %s166_s23, 4  ;;  %p114_p8 = scmp.ne.s32.totalorder %s220_s1, %s113_s27  ;;  %s36_s24 = int_to_ptr.vmem [resolvable:$true] %s35_s24 }
  0x15   :  { %p117_p9 = scmp.lt.u32.totalorder %s113_s27, %s220_s1 }
  0x17   :  { %p119_p10 = pnand %p117_p9, %p114_p8 }
  0x19   :  { %122 = shalt.err (!%p119_p10)
}
  0x1a   :  { %s123_s4 = scalar_lea.vmem %s36_s24, 256  ;;  %p128_p12 = scmp.lt.s32.totalorder %s36_s24, %s36_s24 }
  0x1b   :  { %p124_p11 = scmp.ne.s32.totalorder %s36_s24, %s123_s4  ;;  %p129_p13 = scmp.lt.s32.totalorder %s123_s4, %s123_s4 }
  0x1d   :  { %p130_p0 = por %p129_p13, %p128_p12 }
  0x1f   :  { %p131_p1 = pnand %p130_p0, %p124_p11 }
  0x21   :  { %134 = shalt.err (!%p131_p1)
}
  0x22   :  { %41 = dma.hbm_to_vmem [thread:$0]  %s220_s1, 256, %s36_s24, [#allocation6], %s164_s19, %s164_s19, %s165_s20  }
  0x23   :  { %157 = dma.done.wait [#allocation3], 256  }
  0x24   :  { %158 = vsyncadd [#allocation3], 4294967040 }
  0x25   :  { %159 = dma.done.wait [#allocation6], 256  }
  0x26   :  { %160 = vsyncadd [#allocation6], 4294967040  ;;  %v57_v0 = vld [vmem:[#allocation2] sm:$0xff]  ;;  %v58_v1 = vld [vmem:[#allocation2 + $0x8] sm:$0xff]  ;;  %s167_s6 = smov [#allocation7]  }
  0x27   :  { %v59_v2 = vld [vmem:[#allocation5] sm:$0xff]  ;;  %v60_v3 = vld [vmem:[#allocation5 + $0x8] sm:$0xff]  ;;  %s75_s7 = sshll.u32 %s167_s6, 4  ;;  %s76_s7 = int_to_ptr.vmem [resolvable:$true] %s75_s7 }
  0x28   :  { %v61_v4 = vsub.f32 %v57_v0, %v59_v2  ;;  %v62_v5 = vsub.f32 %v58_v1, %v60_v3  ;;  %s135_s8 = scalar_lea.vmem %s76_s7, 128  ;;  %p140_p3 = scmp.lt.s32.totalorder %s76_s7, %s76_s7 }
  0x29   :  { %p136_p2 = scmp.ne.s32.totalorder %s76_s7, %s135_s8  ;;  %p141_p4 = scmp.lt.s32.totalorder %s135_s8, %s135_s8 }
  0x2a   :  { %v63_v6 = vmul.f32 %v61_v4, %v61_v4  ;;  %v64_v7 = vmul.f32 %v62_v5, %v62_v5 }
  0x2b   :  { %p142_p5 = por %p141_p4, %p140_p3 }
  0x2c   :  { %v66_v8 = vadd.f32 %v64_v7, %v63_v6 }
  0x2d   :  { %p143_p6 = pnand %p142_p5, %p136_p2 }
  0x2e   :  { %68 = vst [vmem:[#allocation7] sm:$0xff] %v66_v8 }
  0x2f   :  { %146 = shalt.err (!%p143_p6)
}
  0x30   :  { %s147_s10 = scalar_lea.hbm %s221_s2, 128 }
  0x31   :  { %p148_p7 = scmp.ne.s32.totalorder %s221_s2, %s147_s10  ;;  %p151_p8 = scmp.lt.u32.totalorder %s147_s10, %s221_s2 }
  0x33   :  { %p153_p9 = pnand %p151_p8, %p148_p7 }
  0x35   :  { %156 = shalt.err (!%p153_p9)
}
  0x36   :  { %78 = dma.vmem_to_hbm [thread:$0]  %s76_s7, 128, %s221_s2, [#allocation4]  }
  0x37   :  { %161 = dma.done.wait [#allocation4], 128  }
  0x38   :  { %162 = vsyncadd [#allocation4], 4294967168 }
  0x39   :  { %82 = vsyncpa [#allocation3], 1 }
  0x3a   :  { %83 = vsyncpa [#allocation6], 1 }
  0x3b   :  { %84 = vsyncpa [#allocation4], 1 }

</bundles_post_ra>
